<compile_context>
chip_gen: v7x
topology: tpu7x:2x2x1
jax: 0.10.0
libtpu: 0.0.40
codegen_flags: <defaults>
</compile_context>

<pallas_src>
import functools

import jax
import jax.numpy as jnp
from jax.experimental import pallas as pl
from jax.experimental.pallas import tpu as pltpu


def _round_up(v, m):
    return ((v + m - 1) // m) * m


def _num_tensorcores():
    """Best-effort: 2 TensorCores per chip on v7x, 1 on v5e/v6e."""
    try:
        kind = jax.devices()[0].device_kind.lower()
        return 2 if "7" in kind else 1
    except Exception:  # pragma: no cover - defensive
        return 1


# --------------------------------------------------------------------------
# Kernel: one (tm, tn) output tile; K (reduction) is the innermost grid axis.
# The f32 output block is resident across K and doubles as the accumulator.
# --------------------------------------------------------------------------
def _fc_kernel(x_ref, w_ref, b_ref, o_ref, *, relu):
    k = pl.program_id(2)

    # x tile: (tm, tk); w tile: (tk, tn) -- MXU-native RHS, no transpose.
    prod = jnp.dot(x_ref[...], w_ref[...], preferred_element_type=jnp.float32)

    @pl.when(k == 0)
    def _init():
        o_ref[...] = prod                      # first partial: store directly

    @pl.when(k > 0)
    def _accumulate():
        o_ref[...] += prod

    @pl.when(k == pl.num_programs(2) - 1)
    def _epilogue():
        out = o_ref[...] + b_ref[...]          # (1, tn) broadcasts over rows
        if relu:
            out = jnp.maximum(out, 0.0)
        o_ref[...] = out


# --------------------------------------------------------------------------
# One-time parameter preparation (hoisted out of the per-call path).
# --------------------------------------------------------------------------
def fc_init(weight, bias, *, use_bf16=False, tn=None, tk=None):
    """Pad + transpose the PyTorch-layout weight once.

    weight: (out_features, in_features)   bias: (out_features,)
    Returns a params dict consumed by fc_apply.
    """
    out_f, in_f = weight.shape
    assert bias.shape == (out_f,)
    compute_dtype = jnp.bfloat16 if use_bf16 else jnp.float32

    tn_given = tn is not None
    tk = min(tk or (1024 if use_bf16 else 512), _round_up(in_f, 128))
    tn = min(tn or 512, _round_up(out_f, 128))
    if not tn_given and _num_tensorcores() >= 2 and _round_up(out_f, 128) >= 256:
        # Keep >=2 iterations on the parallel N axis so a small-batch FC still
        # feeds both TensorCores on v7x.
        tn = min(tn, max(128, ((_round_up(out_f, 128) // 2) // 128) * 128))

    Kp = _round_up(in_f, tk)
    Np = _round_up(out_f, tn)

    wt = weight.T.astype(compute_dtype)              # (in_f, out_f)
    if (Kp, Np) == (in_f, out_f):
        wp = wt
    else:
        wp = jnp.zeros((Kp, Np), compute_dtype).at[:in_f, :out_f].set(wt)
    bp = jnp.zeros((1, Np), jnp.float32).at[0, :out_f].set(
        bias.astype(jnp.float32))

    return dict(wp=wp, bp=bp, in_f=in_f, out_f=out_f, Kp=Kp, Np=Np,
                tn=tn, tk=tk, compute_dtype=compute_dtype)


# --------------------------------------------------------------------------
# Forward: y = x @ W.T + b, optional ReLU.
# --------------------------------------------------------------------------
def fc_apply(params, x, relu=True, *, tm=None):
    B, in_f = x.shape
    assert in_f == params["in_f"]
    compute_dtype = params["compute_dtype"]
    Kp, Np = params["Kp"], params["Np"]
    tn, tk = params["tn"], params["tk"]

    # bf16 packs two rows per sublane -> prefer 16-row alignment there.
    row_align = 16 if compute_dtype == jnp.bfloat16 else 8
    tm = min(tm or 512, _round_up(B, row_align))
    Bp = _round_up(B, tm)

    xc = x.astype(compute_dtype)
    if (Bp, Kp) == (B, in_f):
        xp = xc
    else:
        xp = jnp.zeros((Bp, Kp), compute_dtype).at[:B, :in_f].set(xc)

    grid = (Bp // tm, Np // tn, Kp // tk)
    kernel = functools.partial(_fc_kernel, relu=relu)

    # VMEM footprint: double-buffered x/w/bias tiles + double-buffered f32 out.
    dt = jnp.dtype(compute_dtype).itemsize
    vmem_est = (2 * tm * tk * dt + 2 * tk * tn * dt + 2 * tn * 4
                + 2 * tm * tn * 4)
    vmem_limit = min(48 * 1024 * 1024, max(32 * 1024 * 1024, 2 * vmem_est))

    # W is re-streamed grid_m times, x grid_n times.
    bytes_accessed = (grid[1] * Bp * Kp * dt + grid[0] * Kp * Np * dt
                      + Bp * Np * 4 + grid[0] * Np * 4)

    out_padded = pl.pallas_call(
        kernel,
        out_shape=jax.ShapeDtypeStruct((Bp, Np), jnp.float32),
        grid_spec=pltpu.PrefetchScalarGridSpec(
            num_scalar_prefetch=0,
            grid=grid,
            in_specs=[
                pl.BlockSpec((tm, tk), lambda i, j, k: (i, k)),   # x tile
                pl.BlockSpec((tk, tn), lambda i, j, k: (k, j)),   # W.T tile
                pl.BlockSpec((1, tn), lambda i, j, k: (0, j)),    # bias tile
            ],
            out_specs=pl.BlockSpec((tm, tn), lambda i, j, k: (i, j)),
        ),
        compiler_params=pltpu.CompilerParams(
            dimension_semantics=("parallel", "parallel", "arbitrary"),
            vmem_limit_bytes=int(vmem_limit),
        ),
        cost_estimate=pl.CostEstimate(
            flops=2 * Bp * Kp * Np,
            transcendentals=0,
            bytes_accessed=int(bytes_accessed),
        ),
    )(xp, params["wp"], params["bp"])

    if (Bp, Np) == (B, params["out_f"]):
        return out_padded
    return out_padded[:B, :params["out_f"]]


def fc_forward(x, weight, bias, relu=True, *, use_bf16=False,
               tm=None, tn=None, tk=None):
    """One-shot convenience wrapper (prepares params then applies).

    For repeated calls, call fc_init once and reuse the params with fc_apply.
    """
    params = fc_init(weight, bias, use_bf16=use_bf16, tn=tn, tk=tk)
    return fc_apply(params, x, relu=relu, tm=tm)


if __name__ == "__main__":
    key = jax.random.PRNGKey(0)
    k_x, k_w, k_b, k_xb, k_x2, k_w2, k_b2 = jax.random.split(key, 7)

    # --- Test 1: small module-scale shapes, f32 path, ReLU, params reused --
    B, IN, OUT = 4, 32, 16
    bound = 1.0 / jnp.sqrt(jnp.float32(IN))
    x = jax.random.normal(k_x, (B, IN), dtype=jnp.float32)
    w = jax.random.uniform(k_w, (OUT, IN), minval=-bound, maxval=bound,
                           dtype=jnp.float32)
    b = jax.random.uniform(k_b, (OUT,), minval=-bound, maxval=bound,
                           dtype=jnp.float32)

    params = fc_init(w, b, use_bf16=False)       # weight prepared once
    out = fc_apply(params, x, relu=True)
    jax.block_until_ready(out)
    ref = jnp.maximum(x @ w.T + b, 0.0)
    assert out.shape == ref.shape
    assert jnp.allclose(out, ref, atol=1e-3, rtol=1e-3), "f32 path mismatch"

    # Second call reuses the already-padded/transposed weight (hoisted prep).
    xb = jax.random.normal(k_xb, (B, IN), dtype=jnp.float32)
    out_b = fc_apply(params, xb, relu=True)
    jax.block_until_ready(out_b)
    ref_b = jnp.maximum(xb @ w.T + b, 0.0)
    assert jnp.allclose(out_b, ref_b, atol=1e-3, rtol=1e-3), "reuse mismatch"

    # --- Test 2: misaligned shapes, multi-tile grid, bf16 path, no ReLU ----
    B2, IN2, OUT2 = 20, 300, 200
    bound2 = 1.0 / jnp.sqrt(jnp.float32(IN2))
    x2 = jax.random.normal(k_x2, (B2, IN2), dtype=jnp.float32)
    w2 = jax.random.uniform(k_w2, (OUT2, IN2), minval=-bound2, maxval=bound2,
                            dtype=jnp.float32)
    b2 = jax.random.uniform(k_b2, (OUT2,), minval=-bound2, maxval=bound2,
                            dtype=jnp.float32)

    # Small tiles force a (2, 2, 3) grid: exercises padding + K accumulation.
    out2 = fc_forward(x2, w2, b2, relu=False, use_bf16=True,
                      tm=16, tn=128, tk=128)
    jax.block_until_ready(out2)
    x2b = x2.astype(jnp.bfloat16).astype(jnp.float32)
    w2b = w2.astype(jnp.bfloat16).astype(jnp.float32)
    ref2 = x2b @ w2b.T + b2
    assert out2.shape == ref2.shape
    assert jnp.allclose(out2, ref2, atol=2e-3, rtol=2e-3), "bf16 path mismatch"

    print("KERNEL_OK")
</pallas_src>

<mosaic_0001>
module attributes {stable_mosaic.version = 11 : i64} {
  func.func @_fc_kernel(%arg0: i32, %arg1: i32, %arg2: i32, %arg3: memref<8x128xf32, #tpu.memory_space<vmem>>, %arg4: memref<128x128xf32, #tpu.memory_space<vmem>>, %arg5: memref<1x128xf32, #tpu.memory_space<vmem>>, %arg6: memref<8x128xf32, #tpu.memory_space<vmem>>) attributes {dimension_semantics = [#tpu.dimension_semantics<parallel>, #tpu.dimension_semantics<parallel>, #tpu.dimension_semantics<arbitrary>], iteration_bounds = array<i64: 1, 1, 1>, scalar_prefetch = 0 : i64, scratch_operands = 0 : i64, tpu.core_type = #tpu.core_type<tc>, window_params = [{transform_indices = @transform_0, window_bounds = array<i64: 8, 128>}, {transform_indices = @transform_1, window_bounds = array<i64: 128, 128>}, {transform_indices = @transform_2, window_bounds = array<i64: 1, 128>}, {transform_indices = @transform_3, window_bounds = array<i64: 8, 128>}]} {
    %c0 = arith.constant 0 : index
    %c0_0 = arith.constant 0 : index
    %0 = vector.load %arg3[%c0, %c0_0] : memref<8x128xf32, #tpu.memory_space<vmem>>, vector<8x128xf32>
    %c0_1 = arith.constant 0 : index
    %c0_2 = arith.constant 0 : index
    %1 = vector.load %arg4[%c0_1, %c0_2] : memref<128x128xf32, #tpu.memory_space<vmem>>, vector<128x128xf32>
    %cst = arith.constant dense<0.000000e+00> : vector<8x128xf32>
    %2 = tpu.matmul %0, %1, %cst {dimension_numbers = #tpu.dot_dimension_numbers<[1], [0], [0], [1], [0, 0, 1, 1], [], []>} : vector<8x128xf32>, vector<128x128xf32>, vector<8x128xf32> -> vector<8x128xf32>
    %c0_i32 = arith.constant 0 : i32
    %3 = arith.cmpi eq, %arg2, %c0_i32 : i32
    %4 = arith.extui %3 : i1 to i32
    %c0_i32_3 = arith.constant 0 : i32
    %5 = arith.cmpi ne, %4, %c0_i32_3 : i32
    scf.if %5 {
      %c0_8 = arith.constant 0 : index
      %c0_9 = arith.constant 0 : index
      %12 = vector.load %arg6[%c0_8, %c0_9] : memref<8x128xf32, #tpu.memory_space<vmem>>, vector<8x128xf32>
      tpu.vector_store %arg6[%c0_8, %c0_9], %2 {strides = array<i32>} : memref<8x128xf32, #tpu.memory_space<vmem>>, vector<8x128xf32>,
    } else {
    }
    %c0_i32_4 = arith.constant 0 : i32
    %6 = arith.cmpi sgt, %arg2, %c0_i32_4 : i32
    %7 = arith.extui %6 : i1 to i32
    %c0_i32_5 = arith.constant 0 : i32
    %8 = arith.cmpi ne, %7, %c0_i32_5 : i32
    scf.if %8 {
      %c0_8 = arith.constant 0 : index
      %c0_9 = arith.constant 0 : index
      %12 = vector.load %arg6[%c0_8, %c0_9] : memref<8x128xf32, #tpu.memory_space<vmem>>, vector<8x128xf32>
      %13 = arith.addf %12, %2 : vector<8x128xf32>
      %c0_10 = arith.constant 0 : index
      %c0_11 = arith.constant 0 : index
      %14 = vector.load %arg6[%c0_10, %c0_11] : memref<8x128xf32, #tpu.memory_space<vmem>>, vector<8x128xf32>
      tpu.vector_store %arg6[%c0_10, %c0_11], %13 {strides = array<i32>} : memref<8x128xf32, #tpu.memory_space<vmem>>, vector<8x128xf32>,
    } else {
    }
    %c0_i32_6 = arith.constant 0 : i32
    %9 = arith.cmpi eq, %arg2, %c0_i32_6 : i32
    %10 = arith.extui %9 : i1 to i32
    %c0_i32_7 = arith.constant 0 : i32
    %11 = arith.cmpi ne, %10, %c0_i32_7 : i32
    scf.if %11 {
      %c0_8 = arith.constant 0 : index
      %c0_9 = arith.constant 0 : index
      %12 = vector.load %arg6[%c0_8, %c0_9] : memref<8x128xf32, #tpu.memory_space<vmem>>, vector<8x128xf32>
      %c0_10 = arith.constant 0 : index
      %c0_11 = arith.constant 0 : index
      %13 = vector.load %arg5[%c0_10, %c0_11] : memref<1x128xf32, #tpu.memory_space<vmem>>, vector<1x128xf32>
      %14 = vector.broadcast %13 : vector<1x128xf32> to vector<8x128xf32>
      %15 = arith.addf %12, %14 : vector<8x128xf32>
      %cst_12 = arith.constant 0.000000e+00 : f32
      %16 = vector.broadcast %cst_12 : f32 to vector<8x128xf32>
      %17 = arith.maximumf %15, %16 : vector<8x128xf32>
      %c0_13 = arith.constant 0 : index
      %c0_14 = arith.constant 0 : index
      %18 = vector.load %arg6[%c0_13, %c0_14] : memref<8x128xf32, #tpu.memory_space<vmem>>, vector<8x128xf32>
      tpu.vector_store %arg6[%c0_13, %c0_14], %17 {strides = array<i32>} : memref<8x128xf32, #tpu.memory_space<vmem>>, vector<8x128xf32>,
    } else {
    }
    return
  }
  func.func @transform_0(%arg0: i32, %arg1: i32, %arg2: i32) -> (i32, i32) {
    %c0_i32 = arith.constant 0 : i32
    return %arg0, %arg2 : i32, i32
  }
  func.func @transform_1(%arg0: i32, %arg1: i32, %arg2: i32) -> (i32, i32) {
    %c0_i32 = arith.constant 0 : i32
    return %arg2, %arg1 : i32, i32
  }
  func.func @transform_2(%arg0: i32, %arg1: i32, %arg2: i32) -> (i32, i32) {
    %c0_i32 = arith.constant 0 : i32
    %c0_i32_0 = arith.constant 0 : i32
    return %c0_i32, %arg1 : i32, i32
  }
  func.func @transform_3(%arg0: i32, %arg1: i32, %arg2: i32) -> (i32, i32) {
    %c0_i32 = arith.constant 0 : i32
    return %arg0, %arg1 : i32, i32
  }
}

</mosaic_0001>

<bundles_post_ra>
// kernel: tpu_custom_call.1
= control target key start
LH: loop header
LB: loop body
LE: loop exit
PB: predicated region body
PF: predicated region fallthrough
CT: control target
= control target key end

     0   :  { %8 = vsyncpa [#allocation3], 0  ;;  %s401_s0 = inlined_call_operand.hbm [shape: f32[8,128], index: 0, kind: input, shape index: {}]   ;;  %s402_s1 = inlined_call_operand.hbm [shape: f32[128,128], index: 1, kind: input, shape index: {}]   ;;  %s403_s2 = inlined_call_operand.vmem [shape: f32[1,128], index: 2, kind: input, shape index: {}]   ;;  %s404_s3 = inlined_call_operand.hbm [shape: f32[8,128], index: 3, kind: output, shape index: {}]  }
   0x1   :  { %9 = vsyncpa [#allocation6], 0 }
   0x2   :  { %10 = vsyncpa [#allocation4], 0  ;;  %s327_s12 = smov [#allocation2]   ;;  %s328_s14 = smov [#allocation5]  }
   0x3   :  { %s17_s13 = sshll.u32 %s327_s12, 4  ;;  %s26_s15 = sshll.u32 %s328_s14, 4  ;;  %s18_s13 = int_to_ptr.vmem [resolvable:$true] %s17_s13  ;;  %s355_s15 = int_to_ptr.vmem [resolvable:$true] %s26_s15 }
   0x4   :  { %s255_s18 = scalar_lea.hbm %s401_s0, 128 }
   0x5   :  { %p256_p0 = scmp.ne.s32.totalorder %s401_s0, %s255_s18  ;;  %p259_p1 = scmp.lt.u32.totalorder %s255_s18, %s401_s0 }
   0x7   :  { %p261_p2 = pnand %p259_p1, %p256_p0 }
   0x9   :  { %264 = shalt.err (!%p261_p2)
}
   0xa   :  { %s265_s23 = scalar_lea.vmem %s18_s13, 128  ;;  %p270_p4 = scmp.lt.s32.totalorder %s18_s13, %s18_s13 }
   0xb   :  { %p266_p3 = scmp.ne.s32.totalorder %s18_s13, %s265_s23  ;;  %p271_p5 = scmp.lt.s32.totalorder %s265_s23, %s265_s23 }
   0xd   :  { %p272_p6 = por %p271_p5, %p270_p4 }
   0xf   :  { %p273_p7 = pnand %p272_p6, %p266_p3 }
  0x11   :  { %276 = shalt.err (!%p273_p7)
}
  0x12   :  { %20 = dma.hbm_to_vmem [thread:$0]  %s401_s0, 128, %s18_s13, [#allocation3]  }
  0x13   :  { %s277_s28 = scalar_lea.hbm %s402_s1, 2048 }
  0x14   :  { %p278_p8 = scmp.ne.s32.totalorder %s402_s1, %s277_s28  ;;  %p281_p9 = scmp.lt.u32.totalorder %s277_s28, %s402_s1 }
  0x16   :  { %p283_p10 = pnand %p281_p9, %p278_p8 }
  0x18   :  { %286 = shalt.err (!%p283_p10)
}
  0x19   :  { %s287_s6 = scalar_lea.vmem %s355_s15, 2048  ;;  %p292_p12 = scmp.lt.s32.totalorder %s355_s15, %s355_s15 }
  0x1a   :  { %p288_p11 = scmp.ne.s32.totalorder %s355_s15, %s287_s6  ;;  %p293_p13 = scmp.lt.s32.totalorder %s287_s6, %s287_s6 }
  0x1c   :  { %p294_p0 = por %p293_p13, %p292_p12 }
  0x1e   :  { %p295_p1 = pnand %p294_p0, %p288_p11 }
  0x20   :  { %298 = shalt.err (!%p295_p1)
}
  0x21   :  { %s329_s0 = smov 128   ;;  %s330_s7 = smov 8  }
  0x22   :  { %32 = dma.hbm_to_vmem [thread:$0]  %s402_s1, 2048, %s355_s15, [#allocation6], %s329_s0, %s329_s0, %s330_s7  }
  0x23   :  { %321 = dma.done.wait [#allocation3], 128  }
  0x24   :  { %322 = vsyncadd [#allocation3], 4294967168 }
  0x25   :  { %323 = dma.done.wait [#allocation6], 2048  }
  0x26   :  { %324 = vsyncadd [#allocation6], 4294965248  ;;  %v331_v0 = vmov 0.0|0.0   ;;  %vm332_vm0 = vmmov 0   ;;  %v333_v1 = vmov 0.0   ;;  %v42_v2 = vld [vmem:[#allocation5] sm:$0xff] }
  0x27   :  { %223 = vmatprep.subr.bf16.mxu0 %v331_v0  ;;  %220 = vmatprep.mubr.msk.f32.mxu0 %vm332_vm0, %v333_v1  ;;  %v43_v3 = vld [vmem:[#allocation5 + $0x8] sm:$0xff]  ;;  %v44_v4 = vld [vmem:[#allocation5 + $0x10] sm:$0xff]  ;;  %v45_v6 = vld [vmem:[#allocation5 + $0x18] sm:$0xff]  ;;  %s334_s11 = smov [#allocation7]  }
  0x28   :  { %v224_v5 = vpack.c.bf16 %v43_v3, %v42_v2  ;;  %v227_v7 = vpack.c.bf16 %v45_v6, %v44_v4  ;;  %v46_v8 = vld [vmem:[#allocation5 + $0x20] sm:$0xff]  ;;  %v47_v9 = vld [vmem:[#allocation5 + $0x28] sm:$0xff]  ;;  %v48_v11 = vld [vmem:[#allocation5 + $0x30] sm:$0xff]  ;;  %s160_s12 = sshll.u32 %s334_s11, 4  ;;  %s161_s12 = int_to_ptr.vmem [resolvable:$true] %s160_s12 }
  0x29   :  { %v230_v10 = vpack.c.bf16 %v47_v9, %v46_v8  ;;  %v49_v12 = vld [vmem:[#allocation5 + $0x38] sm:$0xff]  ;;  %v50_v14 = vld [vmem:[#allocation5 + $0x40] sm:$0xff]  ;;  %v51_v15 = vld [vmem:[#allocation5 + $0x48] sm:$0xff]  ;;  %s299_s13 = scalar_lea.vmem %s161_s12, 128  ;;  %p304_p3 = scmp.lt.s32.totalorder %s161_s12, %s161_s12 }
  0x2a   :  { %225 = vmatpush3.bf16.msra.mxu0 %v224_v5  ;;  %v233_v13 = vpack.c.bf16 %v49_v12, %v48_v11  ;;  %v236_v16 = vpack.c.bf16 %v51_v15, %v50_v14  ;;  %v52_v17 = vld [vmem:[#allocation5 + $0x50] sm:$0xff]  ;;  %v53_v18 = vld [vmem:[#allocation5 + $0x58] sm:$0xff]  ;;  %v54_v20 = vld [vmem:[#allocation5 + $0x60] sm:$0xff]  ;;  %p300_p2 = scmp.ne.s32.totalorder %s161_s12, %s299_s13  ;;  %p305_p4 = scmp.lt.s32.totalorder %s299_s13, %s299_s13 }
  0x2b   :  { %226 = vmatprep.subr.bf16.mxu0 %v331_v0  ;;  %v239_v19 = vpack.c.bf16 %v53_v18, %v52_v17  ;;  %v55_v21 = vld [vmem:[#allocation5 + $0x68] sm:$0xff]  ;;  %v56_v23 = vld [vmem:[#allocation5 + $0x70] sm:$0xff]  ;;  %v57_v24 = vld [vmem:[#allocation5 + $0x78] sm:$0xff] }
  0x2c   :  { %v242_v22 = vpack.c.bf16 %v55_v21, %v54_v20  ;;  %v245_v25 = vpack.c.bf16 %v57_v24, %v56_v23  ;;  %v41_v26 = vld [vmem:[#allocation2] sm:$0xff]  ;;  %p306_p5 = por %p305_p4, %p304_p3 }
  0x2d   :  { %v170_v27 = vld [vmem:[%s403_s2] ss:$0 sm:$0xff] }
  0x2e   :  { %228 = vmatpush3.bf16.msra.mxu0 %v227_v7  ;;  %p307_p6 = pnand %p306_p5, %p300_p2 }
  0x2f   :  { %229 = vmatprep.subr.bf16.mxu0 %v331_v0 }
  0x32   :  { %231 = vmatpush3.bf16.msra.mxu0 %v230_v10 }
  0x33   :  { %232 = vmatprep.subr.bf16.mxu0 %v331_v0 }
  0x36   :  { %234 = vmatpush3.bf16.msra.mxu0 %v233_v13 }
  0x37   :  { %235 = vmatprep.subr.bf16.mxu0 %v331_v0 }
  0x3a   :  { %237 = vmatpush3.bf16.msra.mxu0 %v236_v16 }
  0x3b   :  { %238 = vmatprep.subr.bf16.mxu0 %v331_v0 }
  0x3e   :  { %240 = vmatpush3.bf16.msra.mxu0 %v239_v19 }
  0x3f   :  { %241 = vmatprep.subr.bf16.mxu0 %v331_v0 }
  0x42   :  { %243 = vmatpush3.bf16.msra.mxu0 %v242_v22 }
  0x43   :  { %244 = vmatprep.subr.bf16.mxu0 %v331_v0 }
  0x46   :  { %246 = vmatpush3.bf16.msra.mxu0 %v245_v25 }
  0x49   :  { %221 = vmatmul.mubr.f32.vlgmr.msra.gmra.mrb[0].mxu0 %v41_v26 }
 0x11c   :  { %v124_v28 = vpop.f32.mrb[0].mxu0 }
 0x11d   :  { %v222_v29 = vpop.f32.mrb[1].mxu0  ;;  %v151_v30 = vadd.f32 %v170_v27, %v124_v28 }
 0x11f   :  { %v152_v31 = vmax.f32 %v151_v30, 0.0 }
 0x121   :  { %153 = vst [vmem:[#allocation7] sm:$0xff] %v152_v31 }
 0x122   :  { %310 = shalt.err (!%p307_p6)
}
 0x123   :  { %s311_s16 = scalar_lea.hbm %s404_s3, 128 }
 0x124   :  { %p312_p7 = scmp.ne.s32.totalorder %s404_s3, %s311_s16  ;;  %p315_p8 = scmp.lt.u32.totalorder %s311_s16, %s404_s3 }
 0x126   :  { %p317_p9 = pnand %p315_p8, %p312_p7 }
 0x128   :  { %320 = shalt.err (!%p317_p9)
}
 0x129   :  { %163 = dma.vmem_to_hbm [thread:$0]  %s161_s12, 128, %s404_s3, [#allocation4]  }
 0x12a   :  { %325 = dma.done.wait [#allocation4], 128  }
 0x12b   :  { %326 = vsyncadd [#allocation4], 4294967168 }
 0x12c   :  { %167 = vsyncpa [#allocation3], 1 }
 0x12d   :  { %168 = vsyncpa [#allocation6], 1 }
 0x12e   :  { %169 = vsyncpa [#allocation4], 1 }

</bundles_post_ra>
